<compile_context>
chip_gen: v6e
topology: v6e:2x2x1
jax: 0.10.0
libtpu: 0.0.40
codegen_flags: <defaults>
</compile_context>

<pallas_src>
from functools import partial

import jax
import jax.numpy as jnp
import numpy as np
from jax import lax
from jax.experimental import pallas as pl
from jax.experimental.pallas import tpu as pltpu

EPS = 1e-5          # nn.BatchNorm1d default eps
NEG_BIG = -1e30     # bias for padded class lanes (vanishes under log_softmax)


def _round_up(n, m):
    return ((n + m - 1) // m) * m


def _convnn_kernel(x_ref, w1, a1, w2, a2, w3, a3, wl, bl, out_ref,
                   *, channels, pool_k):
    """One batch tile: batch on sublanes, flattened (position, channel) on lanes."""
    h = x_ref[...]                                            # (Bt, S*F)
    for w, a, c in zip((w1, w2, w3), (a1, a2, a3), channels):
        # Conv1d(valid) (previous layer's pool-selection already folded into w)
        # as one MXU matmul; bf16 operands, f32 accumulation.
        acc = jnp.dot(h.astype(w.dtype), w[...],
                      preferred_element_type=jnp.float32)
        # Folded (conv bias + eval-mode BatchNorm) affine, then ReLU (VPU, f32).
        acc = jnp.maximum(acc * a[0:1, :] + a[1:2, :], 0.0)
        # MaxPool1d(kernel=stride=K): max over (K-1) lane rotations (XLU slot).
        # roll(acc, n - j*c)[:, m] == acc[:, m + j*c] (circular); wrap-around
        # never lands on a selected lane because K*lp <= lc, and unselected
        # lanes hit exactly-zero rows of the next (folded) weight.
        n = acc.shape[-1]
        maxed = acc
        for j in range(1, pool_k):
            maxed = jnp.maximum(maxed, pltpu.roll(acc, n - j * c, axis=1))
        h = maxed
    # flatten(start_dim=1) + Linear (pool-selection + class padding folded
    # host-side).  Logits and log_softmax stay in f32 so the -1e30 pad lanes
    # underflow to exactly 0 under exp.
    logits = jnp.dot(h.astype(wl.dtype), wl[...],
                     preferred_element_type=jnp.float32) + bl[...]
    m = jnp.max(logits, axis=-1, keepdims=True)
    z = logits - m
    lse = jnp.log(jnp.sum(jnp.exp(z), axis=-1, keepdims=True))
    out_ref[...] = z - lse


def convnn_clas_forward(x, packed, out_size, channels, pool_k,
                        *, max_batch_tile=512):
    """x: (B, seq_len, n_feats) float32.  Returns (B, out_size) log-probs."""
    B, S, F = x.shape
    in_dtype = packed[0].dtype
    x2 = x.reshape(B, S * F).astype(in_dtype)
    opad = packed[-1].shape[-1]          # padded class dim (multiple of 128)

    # Batch tile selection:
    #  * always a multiple of 8 (full vregs, unmasked output stores); a
    #    multiple of 16 whenever the bf16 input is actually tiled;
    #  * >= 2 grid steps once B > 16 so both v7x TensorCores get work
    #    (batch axis is "parallel"); a single step for tiny batches.
    if B <= 16:
        btile = _round_up(B, 8)
    elif B <= max_batch_tile:
        btile = _round_up(pl.cdiv(B, 2), 16)
    else:
        btile = _round_up(max_batch_tile, 16)
    bpad = _round_up(B, btile)
    if bpad != B:
        x2 = jnp.pad(x2, ((0, bpad - B), (0, 0)))

    def full_spec(a):
        r = a.ndim
        return pl.BlockSpec(a.shape, lambda b, _r=r: (0,) * _r)

    grid_spec = pltpu.PrefetchScalarGridSpec(
        num_scalar_prefetch=0,
        grid=(bpad // btile,),
        in_specs=[pl.BlockSpec((btile, S * F), lambda b: (b, 0))]
                 + [full_spec(a) for a in packed],
        out_specs=pl.BlockSpec((btile, opad), lambda b: (b, 0)),
    )
    # VMEM budget: even at btile=1024 the double-buffered bf16 input tile is
    # ~2.2 MiB, the f32 output ~1 MiB and all params <0.5 MiB -- far below the
    # 32 MiB scoped default and v7x's 64 MiB physical VMEM, so no
    # vmem_limit_bytes override is needed.
    kernel = partial(_convnn_kernel, channels=tuple(channels), pool_k=pool_k)
    out = pl.pallas_call(
        kernel,
        out_shape=jax.ShapeDtypeStruct((bpad, opad), jnp.float32),
        grid_spec=grid_spec,
        compiler_params=pltpu.CompilerParams(
            dimension_semantics=("parallel",)),
    )(x2, *packed)
    return out[:B, :out_size]


# ----------------------- host-side parameter packing -----------------------

def _toeplitz_conv_weight(w, l_in):
    """w: torch layout (Cout, Cin, K) -> block-Toeplitz (l_in*Cin, lc*Cout)."""
    cout, cin, k = w.shape
    lc = l_in - k + 1
    wt = np.zeros((l_in * cin, lc * cout), np.float32)
    wn = np.asarray(w, np.float32)
    for t in range(lc):
        for kk in range(k):
            wt[(t + kk) * cin:(t + kk + 1) * cin,
               t * cout:(t + 1) * cout] = wn[:, :, kk].T
    return wt


def _pool_select(lc, cout, k):
    """0/1 matrix so (maxed @ sel)[:, p*C+o] == maxed[:, (k*p)*C+o]."""
    lp = (lc - k) // k + 1
    sel = np.zeros((lc * cout, lp * cout), np.float32)
    for p in range(lp):
        for o in range(cout):
            sel[(k * p) * cout + o, p * cout + o] = 1.0
    return sel, lp


def make_params(key, seq_len, n_feats, hidden, K, cnv_l, out_size,
                *, compute_dtype=jnp.bfloat16):
    """Deterministic synthetic params.  Returns (torch_style, kernel_packed)."""
    torch_p = {}
    keys = jax.random.split(key, 6 * len(hidden) + 2)
    ki = 0
    cin, l_in = n_feats, seq_len
    toeplitz, affines, sels = [], [], []
    for i, cout in enumerate(hidden):
        w = jax.random.normal(keys[ki], (cout, cin, K), jnp.float32) * 0.3; ki += 1
        b = jax.random.normal(keys[ki], (cout,), jnp.float32) * 0.1; ki += 1
        gamma = 1.0 + 0.1 * jax.random.normal(keys[ki], (cout,), jnp.float32); ki += 1
        beta = 0.1 * jax.random.normal(keys[ki], (cout,), jnp.float32); ki += 1
        rmean = 0.1 * jax.random.normal(keys[ki], (cout,), jnp.float32); ki += 1
        rvar = jax.random.uniform(keys[ki], (cout,), jnp.float32, 0.5, 1.5); ki += 1
        torch_p[f"block{i}"] = (w, b, gamma, beta, rmean, rvar)

        lc = l_in - K + 1
        scale_c = gamma * lax.rsqrt(rvar + EPS)
        shift_c = (b - rmean) * scale_c + beta
        affines.append(jnp.stack([jnp.tile(scale_c, lc), jnp.tile(shift_c, lc)], 0))
        toeplitz.append(_toeplitz_conv_weight(w, l_in))
        sel, lp = _pool_select(lc, cout, K)
        sels.append(sel)
        cin, l_in = cout, lp
    assert l_in == cnv_l

    wlin = jax.random.normal(keys[ki], (out_size, hidden[-1] * cnv_l),
                             jnp.float32) * 0.3; ki += 1
    blin = 0.1 * jax.random.normal(keys[ki], (out_size,), jnp.float32)
    torch_p["out"] = (wlin, blin)

    # torch flatten is channel-major (c*cnv_l + l); kernel lanes are
    # position-major (l*C + c).  Repack and zero-pad classes to 128 lanes.
    opad = max(128, ((out_size + 127) // 128) * 128)
    wr = np.zeros((cnv_l * hidden[-1], opad), np.float32)
    wlin_n = np.asarray(wlin)
    for l in range(cnv_l):
        for c in range(hidden[-1]):
            wr[l * hidden[-1] + c, :out_size] = wlin_n[:, c * cnv_l + l]
    br = np.full((1, opad), NEG_BIG, np.float32)
    br[0, :out_size] = np.asarray(blin)

    # Fold each pool-selection matrix into the NEXT matmul's weight (exact:
    # (maxed @ sel) @ W == maxed @ (sel @ W)), removing all narrow-N matmuls.
    conv_ws = [toeplitz[0]]
    for i in range(1, len(hidden)):
        conv_ws.append(sels[i - 1] @ toeplitz[i])
    wlin_folded = sels[-1] @ wr

    packed = []
    for i in range(len(hidden)):
        packed.append(jnp.asarray(conv_ws[i], compute_dtype))   # MXU operand
        packed.append(affines[i].astype(jnp.float32))           # VPU affine (f32)
    packed.append(jnp.asarray(wlin_folded, compute_dtype))
    packed.append(jnp.asarray(br, jnp.float32))
    return torch_p, tuple(packed)


def reference_forward(x, torch_p, hidden, K):
    """Pure-JAX reference mirroring the PyTorch forward (eval-mode BN)."""
    h = jnp.transpose(x, (0, 2, 1))  # NCW
    for i in range(len(hidden)):
        w, b, gamma, beta, rmean, rvar = torch_p[f"block{i}"]
        h = lax.conv_general_dilated(h, w, (1,), 'VALID',
                                     dimension_numbers=('NCH', 'OIH', 'NCH'))
        h = h + b[None, :, None]
        h = ((h - rmean[None, :, None])
             * (gamma / jnp.sqrt(rvar + EPS))[None, :, None]
             + beta[None, :, None])
        h = jnp.maximum(h, 0.0)
        h = lax.reduce_window(h, -jnp.inf, lax.max,
                              (1, 1, K), (1, 1, K), 'VALID')
    flat = h.reshape(h.shape[0], -1)
    wlin, blin = torch_p["out"]
    logits = flat @ wlin.T + blin[None, :]
    return jax.nn.log_softmax(logits, axis=1)


if __name__ == "__main__":
    # Hyper-params: n_blocks=3, kernel_size=3.  seq_len=66 keeps the module's
    # own cnv_l formula consistent with the true conv/pool lengths:
    # 66 -> 64 -> 21 -> 19 -> 6 -> 4 -> 1.
    batch, seq_len, n_feats = 2, 66, 8
    hidden = [4, 4, 4]
    K = 3
    out_size = 3

    cnv_l = seq_len
    for _ in hidden:
        cnv_l = (cnv_l - K) // K
    L = seq_len
    for _ in hidden:
        L = ((L - K + 1) - K) // K + 1
    assert cnv_l == L and cnv_l >= 1, "chosen seq_len must keep module consistent"

    key = jax.random.PRNGKey(0)
    kx, kp = jax.random.split(key)
    x = jax.random.normal(kx, (batch, seq_len, n_feats), jnp.float32)

    # 1) Exact structural check (f32 packing): validates the Toeplitz/affine
    #    packing, the roll-based pooling and the selection folding bit-tightly.
    torch_p, packed_f32 = make_params(kp, seq_len, n_feats, hidden, K, cnv_l,
                                      out_size, compute_dtype=jnp.float32)
    ref = reference_forward(x, torch_p, hidden, K)
    out_f32 = jax.block_until_ready(
        convnn_clas_forward(x, packed_f32, out_size, hidden, K))
    np.testing.assert_allclose(np.asarray(out_f32), np.asarray(ref),
                               rtol=1e-4, atol=1e-4)

    # 2) Fast path (bf16 MXU operands, f32 accumulation).  Loose tolerance
    #    only reflects bf16 operand rounding; structure is validated above.
    _, packed_bf16 = make_params(kp, seq_len, n_feats, hidden, K, cnv_l,
                                 out_size, compute_dtype=jnp.bfloat16)
    out = jax.block_until_ready(
        convnn_clas_forward(x, packed_bf16, out_size, hidden, K))
    np.testing.assert_allclose(np.asarray(out), np.asarray(ref),
                               rtol=1e-1, atol=1e-1)
    print("KERNEL_OK")
</pallas_src>

<mosaic_0001>
module attributes {stable_mosaic.version = 11 : i64} {
  func.func @_convnn_kernel(%arg0: i32, %arg1: memref<8x528xf32, #tpu.memory_space<vmem>>, %arg2: memref<528x256xf32, #tpu.memory_space<vmem>>, %arg3: memref<2x256xf32, #tpu.memory_space<vmem>>, %arg4: memref<256x76xf32, #tpu.memory_space<vmem>>, %arg5: memref<2x76xf32, #tpu.memory_space<vmem>>, %arg6: memref<76x16xf32, #tpu.memory_space<vmem>>, %arg7: memref<2x16xf32, #tpu.memory_space<vmem>>, %arg8: memref<16x128xf32, #tpu.memory_space<vmem>>, %arg9: memref<1x128xf32, #tpu.memory_space<vmem>>, %arg10: memref<8x128xf32, #tpu.memory_space<vmem>>) attributes {dimension_semantics = [#tpu.dimension_semantics<parallel>], iteration_bounds = array<i64: 1>, scalar_prefetch = 0 : i64, scratch_operands = 0 : i64, tpu.core_type = #tpu.core_type<tc>, window_params = [{transform_indices = @transform_0, window_bounds = array<i64: 8, 528>}, {pipeline_mode = #tpu.pipeline_mode<synchronous>, transform_indices = @transform_1, window_bounds = array<i64: 528, 256>}, {pipeline_mode = #tpu.pipeline_mode<synchronous>, transform_indices = @transform_2, window_bounds = array<i64: 2, 256>}, {pipeline_mode = #tpu.pipeline_mode<synchronous>, transform_indices = @transform_3, window_bounds = array<i64: 256, 76>}, {pipeline_mode = #tpu.pipeline_mode<synchronous>, transform_indices = @transform_4, window_bounds = array<i64: 2, 76>}, {pipeline_mode = #tpu.pipeline_mode<synchronous>, transform_indices = @transform_5, window_bounds = array<i64: 76, 16>}, {pipeline_mode = #tpu.pipeline_mode<synchronous>, transform_indices = @transform_6, window_bounds = array<i64: 2, 16>}, {pipeline_mode = #tpu.pipeline_mode<synchronous>, transform_indices = @transform_7, window_bounds = array<i64: 16, 128>}, {pipeline_mode = #tpu.pipeline_mode<synchronous>, transform_indices = @transform_8, window_bounds = array<i64: 1, 128>}, {transform_indices = @transform_9, window_bounds = array<i64: 8, 128>}]} {
    %c0 = arith.constant 0 : index
    %c0_0 = arith.constant 0 : index
    %0 = vector.load %arg1[%c0, %c0_0] : memref<8x528xf32, #tpu.memory_space<vmem>>, vector<8x528xf32>
    %c0_1 = arith.constant 0 : index
    %c0_2 = arith.constant 0 : index
    %1 = vector.load %arg2[%c0_1, %c0_2] : memref<528x256xf32, #tpu.memory_space<vmem>>, vector<528x256xf32>
    %cst = arith.constant dense<0.000000e+00> : vector<8x256xf32>
    %2 = tpu.matmul %0, %1, %cst {dimension_numbers = #tpu.dot_dimension_numbers<[1], [0], [0], [1], [0, 0, 1, 1], [], []>} : vector<8x528xf32>, vector<528x256xf32>, vector<8x256xf32> -> vector<8x256xf32>
    %c0_3 = arith.constant 0 : index
    %c0_4 = arith.constant 0 : index
    %3 = vector.load %arg3[%c0_3, %c0_4] : memref<2x256xf32, #tpu.memory_space<vmem>>, vector<1x256xf32>
    %4 = vector.broadcast %3 : vector<1x256xf32> to vector<8x256xf32>
    %5 = arith.mulf %2, %4 : vector<8x256xf32>
    %c1 = arith.constant 1 : index
    %c0_5 = arith.constant 0 : index
    %6 = vector.load %arg3[%c1, %c0_5] : memref<2x256xf32, #tpu.memory_space<vmem>>, vector<1x256xf32>
    %7 = vector.broadcast %6 : vector<1x256xf32> to vector<8x256xf32>
    %8 = arith.addf %5, %7 : vector<8x256xf32>
    %cst_6 = arith.constant 0.000000e+00 : f32
    %9 = vector.broadcast %cst_6 : f32 to vector<8x256xf32>
    %10 = arith.maximumf %8, %9 : vector<8x256xf32>
    %c252_i32 = arith.constant 252 : i32
    %11 = tpu.dynamic_rotate %10 by %c252_i32 dim 1 : vector<8x256xf32>, i32 -> vector<8x256xf32>
    %12 = arith.maximumf %10, %11 : vector<8x256xf32>
    %c248_i32 = arith.constant 248 : i32
    %13 = tpu.dynamic_rotate %10 by %c248_i32 dim 1 : vector<8x256xf32>, i32 -> vector<8x256xf32>
    %14 = arith.maximumf %12, %13 : vector<8x256xf32>
    %c0_7 = arith.constant 0 : index
    %c0_8 = arith.constant 0 : index
    %15 = vector.load %arg4[%c0_7, %c0_8] : memref<256x76xf32, #tpu.memory_space<vmem>>, vector<256x76xf32>
    %cst_9 = arith.constant dense<0.000000e+00> : vector<8x76xf32>
    %16 = tpu.matmul %14, %15, %cst_9 {dimension_numbers = #tpu.dot_dimension_numbers<[1], [0], [0], [1], [0, 0, 1, 1], [], []>} : vector<8x256xf32>, vector<256x76xf32>, vector<8x76xf32> -> vector<8x76xf32>
    %c0_10 = arith.constant 0 : index
    %c0_11 = arith.constant 0 : index
    %17 = vector.load %arg5[%c0_10, %c0_11] : memref<2x76xf32, #tpu.memory_space<vmem>>, vector<1x76xf32>
    %18 = vector.broadcast %17 : vector<1x76xf32> to vector<8x76xf32>
    %19 = arith.mulf %16, %18 : vector<8x76xf32>
    %c1_12 = arith.constant 1 : index
    %c0_13 = arith.constant 0 : index
    %20 = vector.load %arg5[%c1_12, %c0_13] : memref<2x76xf32, #tpu.memory_space<vmem>>, vector<1x76xf32>
    %21 = vector.broadcast %20 : vector<1x76xf32> to vector<8x76xf32>
    %22 = arith.addf %19, %21 : vector<8x76xf32>
    %cst_14 = arith.constant 0.000000e+00 : f32
    %23 = vector.broadcast %cst_14 : f32 to vector<8x76xf32>
    %24 = arith.maximumf %22, %23 : vector<8x76xf32>
    %c72_i32 = arith.constant 72 : i32
    %25 = tpu.dynamic_rotate %24 by %c72_i32 dim 1 : vector<8x76xf32>, i32 -> vector<8x76xf32>
    %26 = arith.maximumf %24, %25 : vector<8x76xf32>
    %c68_i32 = arith.constant 68 : i32
    %27 = tpu.dynamic_rotate %24 by %c68_i32 dim 1 : vector<8x76xf32>, i32 -> vector<8x76xf32>
    %28 = arith.maximumf %26, %27 : vector<8x76xf32>
    %c0_15 = arith.constant 0 : index
    %c0_16 = arith.constant 0 : index
    %29 = vector.load %arg6[%c0_15, %c0_16] : memref<76x16xf32, #tpu.memory_space<vmem>>, vector<76x16xf32>
    %cst_17 = arith.constant dense<0.000000e+00> : vector<8x16xf32>
    %30 = tpu.matmul %28, %29, %cst_17 {dimension_numbers = #tpu.dot_dimension_numbers<[1], [0], [0], [1], [0, 0, 1, 1], [], []>} : vector<8x76xf32>, vector<76x16xf32>, vector<8x16xf32> -> vector<8x16xf32>
    %c0_18 = arith.constant 0 : index
    %c0_19 = arith.constant 0 : index
    %31 = vector.load %arg7[%c0_18, %c0_19] : memref<2x16xf32, #tpu.memory_space<vmem>>, vector<1x16xf32>
    %32 = vector.broadcast %31 : vector<1x16xf32> to vector<8x16xf32>
    %33 = arith.mulf %30, %32 : vector<8x16xf32>
    %c1_20 = arith.constant 1 : index
    %c0_21 = arith.constant 0 : index
    %34 = vector.load %arg7[%c1_20, %c0_21] : memref<2x16xf32, #tpu.memory_space<vmem>>, vector<1x16xf32>
    %35 = vector.broadcast %34 : vector<1x16xf32> to vector<8x16xf32>
    %36 = arith.addf %33, %35 : vector<8x16xf32>
    %cst_22 = arith.constant 0.000000e+00 : f32
    %37 = vector.broadcast %cst_22 : f32 to vector<8x16xf32>
    %38 = arith.maximumf %36, %37 : vector<8x16xf32>
    %c12_i32 = arith.constant 12 : i32
    %39 = tpu.dynamic_rotate %38 by %c12_i32 dim 1 : vector<8x16xf32>, i32 -> vector<8x16xf32>
    %40 = arith.maximumf %38, %39 : vector<8x16xf32>
    %c8_i32 = arith.constant 8 : i32
    %41 = tpu.dynamic_rotate %38 by %c8_i32 dim 1 : vector<8x16xf32>, i32 -> vector<8x16xf32>
    %42 = arith.maximumf %40, %41 : vector<8x16xf32>
    %c0_23 = arith.constant 0 : index
    %c0_24 = arith.constant 0 : index
    %43 = vector.load %arg8[%c0_23, %c0_24] : memref<16x128xf32, #tpu.memory_space<vmem>>, vector<16x128xf32>
    %cst_25 = arith.constant dense<0.000000e+00> : vector<8x128xf32>
    %44 = tpu.matmul %42, %43, %cst_25 {dimension_numbers = #tpu.dot_dimension_numbers<[1], [0], [0], [1], [0, 0, 1, 1], [], []>} : vector<8x16xf32>, vector<16x128xf32>, vector<8x128xf32> -> vector<8x128xf32>
    %c0_26 = arith.constant 0 : index
    %c0_27 = arith.constant 0 : index
    %45 = vector.load %arg9[%c0_26, %c0_27] : memref<1x128xf32, #tpu.memory_space<vmem>>, vector<1x128xf32>
    %46 = vector.broadcast %45 : vector<1x128xf32> to vector<8x128xf32>
    %47 = arith.addf %44, %46 : vector<8x128xf32>
    %cst_28 = arith.constant dense<0xFF800000> : vector<8xf32>
    %48 = vector.multi_reduction <maximumf>, %47, %cst_28 [1] : vector<8x128xf32> to vector<8xf32>
    %49 = vector.shape_cast %48 : vector<8xf32> to vector<8x1xf32>
    %50 = vector.broadcast %49 : vector<8x1xf32> to vector<8x128xf32>
    %51 = arith.subf %47, %50 : vector<8x128xf32>
    %52 = math.exp %51 : vector<8x128xf32>
    %cst_29 = arith.constant dense<0.000000e+00> : vector<8xf32>
    %53 = vector.multi_reduction <add>, %52, %cst_29 [1] : vector<8x128xf32> to vector<8xf32>
    %54 = vector.shape_cast %53 : vector<8xf32> to vector<8x1xf32>
    %55 = math.log %54 : vector<8x1xf32>
    %56 = vector.broadcast %55 : vector<8x1xf32> to vector<8x128xf32>
    %57 = arith.subf %51, %56 : vector<8x128xf32>
    %c0_30 = arith.constant 0 : index
    %c0_31 = arith.constant 0 : index
    %58 = vector.load %arg10[%c0_30, %c0_31] : memref<8x128xf32, #tpu.memory_space<vmem>>, vector<8x128xf32>
    tpu.vector_store %arg10[%c0_30, %c0_31], %57 {strides = array<i32>} : memref<8x128xf32, #tpu.memory_space<vmem>>, vector<8x128xf32>,
    return
  }
  func.func @transform_0(%arg0: i32) -> (i32, i32) {
    %c0_i32 = arith.constant 0 : i32
    %c0_i32_0 = arith.constant 0 : i32
    return %arg0, %c0_i32 : i32, i32
  }
  func.func @transform_1(%arg0: i32) -> (i32, i32) {
    %c0_i32 = arith.constant 0 : i32
    %c0_i32_0 = arith.constant 0 : i32
    %c0_i32_1 = arith.constant 0 : i32
    return %c0_i32, %c0_i32_0 : i32, i32
  }
  func.func @transform_2(%arg0: i32) -> (i32, i32) {
    %c0_i32 = arith.constant 0 : i32
    %c0_i32_0 = arith.constant 0 : i32
    %c0_i32_1 = arith.constant 0 : i32
    return %c0_i32, %c0_i32_0 : i32, i32
  }
  func.func @transform_3(%arg0: i32) -> (i32, i32) {
    %c0_i32 = arith.constant 0 : i32
    %c0_i32_0 = arith.constant 0 : i32
    %c0_i32_1 = arith.constant 0 : i32
    return %c0_i32, %c0_i32_0 : i32, i32
  }
  func.func @transform_4(%arg0: i32) -> (i32, i32) {
    %c0_i32 = arith.constant 0 : i32
    %c0_i32_0 = arith.constant 0 : i32
    %c0_i32_1 = arith.constant 0 : i32
    return %c0_i32, %c0_i32_0 : i32, i32
  }
  func.func @transform_5(%arg0: i32) -> (i32, i32) {
    %c0_i32 = arith.constant 0 : i32
    %c0_i32_0 = arith.constant 0 : i32
    %c0_i32_1 = arith.constant 0 : i32
    return %c0_i32, %c0_i32_0 : i32, i32
  }
  func.func @transform_6(%arg0: i32) -> (i32, i32) {
    %c0_i32 = arith.constant 0 : i32
    %c0_i32_0 = arith.constant 0 : i32
    %c0_i32_1 = arith.constant 0 : i32
    return %c0_i32, %c0_i32_0 : i32, i32
  }
  func.func @transform_7(%arg0: i32) -> (i32, i32) {
    %c0_i32 = arith.constant 0 : i32
    %c0_i32_0 = arith.constant 0 : i32
    %c0_i32_1 = arith.constant 0 : i32
    return %c0_i32, %c0_i32_0 : i32, i32
  }
  func.func @transform_8(%arg0: i32) -> (i32, i32) {
    %c0_i32 = arith.constant 0 : i32
    %c0_i32_0 = arith.constant 0 : i32
    %c0_i32_1 = arith.constant 0 : i32
    return %c0_i32, %c0_i32_0 : i32, i32
  }
  func.func @transform_9(%arg0: i32) -> (i32, i32) {
    %c0_i32 = arith.constant 0 : i32
    %c0_i32_0 = arith.constant 0 : i32
    return %arg0, %c0_i32 : i32, i32
  }
}

</mosaic_0001>

<bundles_post_ra>
// kernel: tpu_custom_call.1
= control target key start
LH: loop header
LB: loop body
LE: loop exit
PB: predicated region body
PF: predicated region fallthrough
CT: control target
= control target key end

     0   :  { %14 = vsyncpa [#allocation3], 0  ;;  %s1225_s0 = inlined_call_operand.vmem [shape: f32[8,528], index: 0, kind: input, shape index: {}]   ;;  %s1226_s1 = inlined_call_operand.hbm [shape: f32[528,256], index: 1, kind: input, shape index: {}]   ;;  %s1227_s2 = inlined_call_operand.vmem [shape: f32[2,256], index: 2, kind: input, shape index: {}]   ;;  %s1228_s3 = inlined_call_operand.vmem [shape: f32[256,76], index: 3, kind: input, shape index: {}]   ;;  %s1229_s4 = inlined_call_operand.vmem [shape: f32[2,76], index: 4, kind: input, shape index: {}]   ;;  %s1230_s5 = inlined_call_operand.vmem [shape: f32[76,16], index: 5, kind: input, shape index: {}]   ;;  %s1231_s6 = inlined_call_operand.vmem [shape: f32[2,16], index: 6, kind: input, shape index: {}]   ;;  %s1232_s7 = inlined_call_operand.vmem [shape: f32[16,128], index: 7, kind: input, shape index: {}]   ;;  %s1233_s8 = inlined_call_operand.vmem [shape: f32[1,128], index: 8, kind: input, shape index: {}]   ;;  %s1234_s9 = inlined_call_operand.hbm [shape: f32[8,128], index: 9, kind: output, shape index: {}]  }
   0x1   :  { %15 = vsyncpa [#allocation4], 0  ;;  %s964_s30 = smov [#allocation2]  }
   0x2   :  { %s23_s10 = sshll.u32 %s964_s30, 4  ;;  %s24_s10 = int_to_ptr.vmem [resolvable:$true] %s23_s10 }
   0x3   :  { %s928_s11 = scalar_lea.vmem %s24_s10, 16896  ;;  %p933_p1 = scmp.lt.s32.totalorder %s24_s10, %s24_s10 }
   0x4   :  { %p929_p0 = scmp.ne.s32.totalorder %s24_s10, %s928_s11  ;;  %p934_p2 = scmp.lt.s32.totalorder %s928_s11, %s928_s11 }
   0x6   :  { %p935_p3 = por %p934_p2, %p933_p1 }
   0x8   :  { %p936_p4 = pnand %p935_p3, %p929_p0 }
   0xa   :  { %939 = shalt.err (!%p936_p4)
}
   0xb   :  { %s965_s12 = smov 256   ;;  %s966_s13 = smov 16  }
   0xc   :  { %29 = dma.hbm_to_vmem [thread:$0]  %s1226_s1, 16896, %s24_s10, [#allocation3], %s965_s12, %s965_s12, %s966_s13  }
   0xd   :  { %960 = dma.done.wait [#allocation3], 16896  }
   0xe   :  { %961 = vsyncadd [#allocation3], 4294950400  ;;  %v83_v0 = vld [vmem:[#allocation2 + $0xf8] sm:$0xff]  ;;  %v82_v2 = vld [vmem:[#allocation2 + $0xf0] sm:$0xff]  ;;  %vm184_vm0 = vcmask 130048   ;;  %s968_s26 = smov 124  }
   0xf   :  { %v147_v1 = vld [vmem:[#allocation2 + $0x2f8] sm:$0xff]  ;;  %188 = vmatprep.subr.mxu0 %v83_v0  ;;  %v146_v3 = vld [vmem:[#allocation2 + $0x2f0] sm:$0xff]  ;;  %v81_v4 = vld [vmem:[#allocation2 + $0xe8] sm:$0xff]  ;;  %s969_s27 = smov 120   ;;  %vm597_vm3 = vcmask 1043456   ;;  %vm567_vm4 = vcmask 1048160  }
  0x10   :  { %259 = vmatprep.subr.mxu1 %v147_v1  ;;  %v145_v5 = vld [vmem:[#allocation2 + $0x2e8] sm:$0xff]  ;;  %189 = vmatpush1.msra.mxu0 %v82_v2  ;;  %v80_v6 = vld [vmem:[#allocation2 + $0xe0] sm:$0xff]  ;;  %v79_v8 = vld [vmem:[#allocation2 + $0xd8] sm:$0xff]  ;;  %vm971_vm5 = vmmov 0   ;;  %vm593_vm6 = vcmask 621568   ;;  %vm684_vm7 = vcmask 1047680  }
  0x11   :  { %260 = vmatpush1.msra.mxu1 %v146_v3  ;;  %v144_v7 = vld [vmem:[#allocation2 + $0x2e0] sm:$0xff]  ;;  %190 = vmatprep.subr.mxu0 %v81_v4  ;;  %v143_v9 = vld [vmem:[#allocation2 + $0x2d8] sm:$0xff]  ;;  %v78_v10 = vld [vmem:[#allocation2 + $0xd0] sm:$0xff] }
  0x12   :  { %261 = vmatprep.subr.mxu1 %v145_v5  ;;  %v142_v11 = vld [vmem:[#allocation2 + $0x2d0] sm:$0xff]  ;;  %191 = vmatpush1.msra.mxu0 %v80_v6  ;;  %v77_v12 = vld [vmem:[#allocation2 + $0xc8] sm:$0xff]  ;;  %v76_v14 = vld [vmem:[#allocation2 + $0xc0] sm:$0xff] }
  0x13   :  { %262 = vmatpush1.msra.mxu1 %v144_v7  ;;  %v141_v13 = vld [vmem:[#allocation2 + $0x2c8] sm:$0xff]  ;;  %192 = vmatprep.subr.mxu0 %v79_v8  ;;  %v140_v15 = vld [vmem:[#allocation2 + $0x2c0] sm:$0xff]  ;;  %v75_v16 = vld [vmem:[#allocation2 + $0xb8] sm:$0xff] }
  0x14   :  { %263 = vmatprep.subr.mxu1 %v143_v9  ;;  %193 = vmatpush1.msra.mxu0 %v78_v10  ;;  %v139_v17 = vld [vmem:[#allocation2 + $0x2b8] sm:$0xff]  ;;  %v74_v18 = vld [vmem:[#allocation2 + $0xb0] sm:$0xff]  ;;  %v73_v20 = vld [vmem:[#allocation2 + $0xa8] sm:$0xff] }
  0x15   :  { %264 = vmatpush1.msra.mxu1 %v142_v11  ;;  %194 = vmatprep.subr.mxu0 %v77_v12  ;;  %v138_v19 = vld [vmem:[#allocation2 + $0x2b0] sm:$0xff]  ;;  %v137_v21 = vld [vmem:[#allocation2 + $0x2a8] sm:$0xff]  ;;  %v72_v22 = vld [vmem:[#allocation2 + $0xa0] sm:$0xff] }
  0x16   :  { %265 = vmatprep.subr.mxu1 %v141_v13  ;;  %195 = vmatpush1.msra.mxu0 %v76_v14  ;;  %v136_v23 = vld [vmem:[#allocation2 + $0x2a0] sm:$0xff]  ;;  %v71_v24 = vld [vmem:[#allocation2 + $0x98] sm:$0xff]  ;;  %v70_v26 = vld [vmem:[#allocation2 + $0x90] sm:$0xff] }
  0x17   :  { %266 = vmatpush1.msra.mxu1 %v140_v15  ;;  %196 = vmatprep.subr.mxu0 %v75_v16  ;;  %v135_v25 = vld [vmem:[#allocation2 + $0x298] sm:$0xff]  ;;  %v134_v27 = vld [vmem:[#allocation2 + $0x290] sm:$0xff]  ;;  %v69_v28 = vld [vmem:[#allocation2 + $0x88] sm:$0xff] }
  0x18   :  { %267 = vmatprep.subr.mxu1 %v139_v17  ;;  %197 = vmatpush1.msra.mxu0 %v74_v18  ;;  %v133_v29 = vld [vmem:[#allocation2 + $0x288] sm:$0xff]  ;;  %v68_v30 = vld [vmem:[#allocation2 + $0x80] sm:$0xff]  ;;  %v67_v32 = vld [vmem:[#allocation2 + $0x78] sm:$0xff] }
  0x19   :  { %268 = vmatpush1.msra.mxu1 %v138_v19  ;;  %198 = vmatprep.subr.mxu0 %v73_v20  ;;  %v132_v31 = vld [vmem:[#allocation2 + $0x280] sm:$0xff]  ;;  %v131_v33 = vld [vmem:[#allocation2 + $0x278] sm:$0xff]  ;;  %v66_v34 = vld [vmem:[#allocation2 + $0x70] sm:$0xff] }
  0x1a   :  { %269 = vmatprep.subr.mxu1 %v137_v21  ;;  %199 = vmatpush1.msra.mxu0 %v72_v22  ;;  %v130_v35 = vld [vmem:[#allocation2 + $0x270] sm:$0xff]  ;;  %v65_v36 = vld [vmem:[#allocation2 + $0x68] sm:$0xff]  ;;  %v64_v38 = vld [vmem:[#allocation2 + $0x60] sm:$0xff] }
  0x1b   :  { %270 = vmatpush1.msra.mxu1 %v136_v23  ;;  %200 = vmatprep.subr.mxu0 %v71_v24  ;;  %v129_v37 = vld [vmem:[#allocation2 + $0x268] sm:$0xff]  ;;  %v128_v39 = vld [vmem:[#allocation2 + $0x260] sm:$0xff]  ;;  %v63_v40 = vld [vmem:[#allocation2 + $0x58] sm:$0xff] }
  0x1c   :  { %271 = vmatprep.subr.mxu1 %v135_v25  ;;  %201 = vmatpush1.msra.mxu0 %v70_v26  ;;  %v127_v41 = vld [vmem:[#allocation2 + $0x258] sm:$0xff]  ;;  %v62_v42 = vld [vmem:[#allocation2 + $0x50] sm:$0xff]  ;;  %v61_v44 = vld [vmem:[#allocation2 + $0x48] sm:$0xff] }
  0x1d   :  { %272 = vmatpush1.msra.mxu1 %v134_v27  ;;  %202 = vmatprep.subr.mxu0 %v69_v28  ;;  %v126_v43 = vld [vmem:[#allocation2 + $0x250] sm:$0xff]  ;;  %v125_v45 = vld [vmem:[#allocation2 + $0x248] sm:$0xff]  ;;  %v60_v46 = vld [vmem:[#allocation2 + $0x40] sm:$0xff] }
  0x1e   :  { %273 = vmatprep.subr.mxu1 %v133_v29  ;;  %203 = vmatpush1.msra.mxu0 %v68_v30  ;;  %v124_v47 = vld [vmem:[#allocation2 + $0x240] sm:$0xff]  ;;  %v59_v48 = vld [vmem:[#allocation2 + $0x38] sm:$0xff]  ;;  %v58_v50 = vld [vmem:[#allocation2 + $0x30] sm:$0xff] }
  0x1f   :  { %274 = vmatpush1.msra.mxu1 %v132_v31  ;;  %204 = vmatprep.subr.mxu0 %v67_v32  ;;  %v123_v49 = vld [vmem:[#allocation2 + $0x238] sm:$0xff]  ;;  %v122_v51 = vld [vmem:[#allocation2 + $0x230] sm:$0xff]  ;;  %v57_v52 = vld [vmem:[#allocation2 + $0x28] sm:$0xff] }
  0x20   :  { %275 = vmatprep.subr.mxu1 %v131_v33  ;;  %205 = vmatpush1.msra.mxu0 %v66_v34  ;;  %v121_v53 = vld [vmem:[#allocation2 + $0x228] sm:$0xff]  ;;  %v56_v54 = vld [vmem:[#allocation2 + $0x20] sm:$0xff]  ;;  %v55_v56 = vld [vmem:[#allocation2 + $0x18] sm:$0xff] }
  0x21   :  { %276 = vmatpush1.msra.mxu1 %v130_v35  ;;  %206 = vmatprep.subr.mxu0 %v65_v36  ;;  %v120_v55 = vld [vmem:[#allocation2 + $0x220] sm:$0xff]  ;;  %v119_v57 = vld [vmem:[#allocation2 + $0x218] sm:$0xff]  ;;  %v54_v58 = vld [vmem:[#allocation2 + $0x10] sm:$0xff] }
  0x22   :  { %277 = vmatprep.subr.mxu1 %v129_v37  ;;  %207 = vmatpush1.msra.mxu0 %v64_v38  ;;  %v118_v59 = vld [vmem:[#allocation2 + $0x210] sm:$0xff]  ;;  %v53_v60 = vld [vmem:[#allocation2 + $0x8] sm:$0xff]  ;;  %v52_v62 = vld [vmem:[#allocation2] sm:$0xff] }
  0x23   :  { %278 = vmatpush1.msra.mxu1 %v128_v39  ;;  %208 = vmatprep.subr.mxu0 %v63_v40  ;;  %v117_v61 = vld [vmem:[#allocation2 + $0x208] sm:$0xff]  ;;  %v116_v63 = vld [vmem:[#allocation2 + $0x200] sm:$0xff]  ;;  %v115_v0 = vld [vmem:[#allocation2 + $0x1f8] sm:$0xff] }
  0x24   :  { %279 = vmatprep.subr.mxu1 %v127_v41  ;;  %209 = vmatpush1.msra.mxu0 %v62_v42  ;;  %v179_v1 = vld [vmem:[#allocation2 + $0x3f8] sm:$0xff]  ;;  %v114_v2 = vld [vmem:[#allocation2 + $0x1f0] sm:$0xff]  ;;  %v113_v4 = vld [vmem:[#allocation2 + $0x1e8] sm:$0xff] }
  0x25   :  { %280 = vmatpush1.msra.mxu1 %v126_v43  ;;  %210 = vmatprep.subr.mxu0 %v61_v44  ;;  %v178_v3 = vld [vmem:[#allocation2 + $0x3f0] sm:$0xff]  ;;  %v177_v5 = vld [vmem:[#allocation2 + $0x3e8] sm:$0xff]  ;;  %v112_v6 = vld [vmem:[#allocation2 + $0x1e0] sm:$0xff] }
  0x26   :  { %281 = vmatprep.subr.mxu1 %v125_v45  ;;  %211 = vmatpush1.msra.mxu0 %v60_v46  ;;  %v176_v7 = vld [vmem:[#allocation2 + $0x3e0] sm:$0xff]  ;;  %v111_v8 = vld [vmem:[#allocation2 + $0x1d8] sm:$0xff]  ;;  %v110_v10 = vld [vmem:[#allocation2 + $0x1d0] sm:$0xff] }
  0x27   :  { %282 = vmatpush1.msra.mxu1 %v124_v47  ;;  %212 = vmatprep.subr.mxu0 %v59_v48  ;;  %v175_v9 = vld [vmem:[#allocation2 + $0x3d8] sm:$0xff]  ;;  %v174_v11 = vld [vmem:[#allocation2 + $0x3d0] sm:$0xff]  ;;  %v109_v12 = vld [vmem:[#allocation2 + $0x1c8] sm:$0xff] }
  0x28   :  { %283 = vmatprep.subr.mxu1 %v123_v49  ;;  %213 = vmatpush1.msra.mxu0 %v58_v50  ;;  %v173_v13 = vld [vmem:[#allocation2 + $0x3c8] sm:$0xff]  ;;  %v108_v14 = vld [vmem:[#allocation2 + $0x1c0] sm:$0xff]  ;;  %v107_v16 = vld [vmem:[#allocation2 + $0x1b8] sm:$0xff] }
  0x29   :  { %284 = vmatpush1.msra.mxu1 %v122_v51  ;;  %214 = vmatprep.subr.mxu0 %v57_v52  ;;  %v172_v15 = vld [vmem:[#allocation2 + $0x3c0] sm:$0xff]  ;;  %v171_v17 = vld [vmem:[#allocation2 + $0x3b8] sm:$0xff]  ;;  %v106_v18 = vld [vmem:[#allocation2 + $0x1b0] sm:$0xff] }
  0x2a   :  { %285 = vmatprep.subr.mxu1 %v121_v53  ;;  %215 = vmatpush1.msra.mxu0 %v56_v54  ;;  %v170_v19 = vld [vmem:[#allocation2 + $0x3b0] sm:$0xff]  ;;  %v105_v20 = vld [vmem:[#allocation2 + $0x1a8] sm:$0xff]  ;;  %v104_v22 = vld [vmem:[#allocation2 + $0x1a0] sm:$0xff] }
  0x2b   :  { %286 = vmatpush1.msra.mxu1 %v120_v55  ;;  %216 = vmatprep.subr.mxu0 %v55_v56  ;;  %v169_v21 = vld [vmem:[#allocation2 + $0x3a8] sm:$0xff]  ;;  %v168_v23 = vld [vmem:[#allocation2 + $0x3a0] sm:$0xff]  ;;  %v103_v24 = vld [vmem:[#allocation2 + $0x198] sm:$0xff] }
  0x2c   :  { %287 = vmatprep.subr.mxu1 %v119_v57  ;;  %217 = vmatpush1.msra.mxu0 %v54_v58  ;;  %v167_v25 = vld [vmem:[#allocation2 + $0x398] sm:$0xff]  ;;  %v102_v26 = vld [vmem:[#allocation2 + $0x190] sm:$0xff]  ;;  %v101_v28 = vld [vmem:[#allocation2 + $0x188] sm:$0xff] }
  0x2d   :  { %288 = vmatpush1.msra.mxu1 %v118_v59  ;;  %218 = vmatprep.subr.mxu0 %v53_v60  ;;  %v166_v27 = vld [vmem:[#allocation2 + $0x390] sm:$0xff]  ;;  %v165_v29 = vld [vmem:[#allocation2 + $0x388] sm:$0xff]  ;;  %v100_v30 = vld [vmem:[#allocation2 + $0x180] sm:$0xff] }
  0x2e   :  { %289 = vmatprep.subr.mxu1 %v117_v61  ;;  %219 = vmatpush1.msra.mxu0 %v52_v62  ;;  %v164_v31 = vld [vmem:[#allocation2 + $0x380] sm:$0xff]  ;;  %v99_v32 = vld [vmem:[#allocation2 + $0x178] sm:$0xff]  ;;  %v98_v34 = vld [vmem:[#allocation2 + $0x170] sm:$0xff] }
  0x2f   :  { %290 = vmatpush1.msra.mxu1 %v116_v63  ;;  %220 = vmatprep.subr.mxu0 %v115_v0  ;;  %v163_v33 = vld [vmem:[#allocation2 + $0x378] sm:$0xff]  ;;  %v162_v35 = vld [vmem:[#allocation2 + $0x370] sm:$0xff]  ;;  %v97_v36 = vld [vmem:[#allocation2 + $0x168] sm:$0xff] }
  0x30   :  { %291 = vmatprep.subr.mxu1 %v179_v1  ;;  %221 = vmatpush2.msra.mxu0 %v114_v2  ;;  %v161_v37 = vld [vmem:[#allocation2 + $0x368] sm:$0xff]  ;;  %v96_v38 = vld [vmem:[#allocation2 + $0x160] sm:$0xff]  ;;  %v95_v40 = vld [vmem:[#allocation2 + $0x158] sm:$0xff] }
  0x31   :  { %292 = vmatpush2.msra.mxu1 %v178_v3  ;;  %222 = vmatprep.subr.mxu0 %v113_v4  ;;  %v160_v39 = vld [vmem:[#allocation2 + $0x360] sm:$0xff]  ;;  %v159_v41 = vld [vmem:[#allocation2 + $0x358] sm:$0xff]  ;;  %v94_v42 = vld [vmem:[#allocation2 + $0x150] sm:$0xff] }
  0x32   :  { %293 = vmatprep.subr.mxu1 %v177_v5  ;;  %223 = vmatpush2.msra.mxu0 %v112_v6  ;;  %v158_v43 = vld [vmem:[#allocation2 + $0x350] sm:$0xff]  ;;  %v93_v44 = vld [vmem:[#allocation2 + $0x148] sm:$0xff]  ;;  %v92_v46 = vld [vmem:[#allocation2 + $0x140] sm:$0xff] }
  0x33   :  { %294 = vmatpush2.msra.mxu1 %v176_v7  ;;  %224 = vmatprep.subr.mxu0 %v111_v8  ;;  %v157_v45 = vld [vmem:[#allocation2 + $0x348] sm:$0xff]  ;;  %v156_v47 = vld [vmem:[#allocation2 + $0x340] sm:$0xff]  ;;  %v91_v48 = vld [vmem:[#allocation2 + $0x138] sm:$0xff]  ;;  %v967_v8 = vmov 0.0  }
  0x34   :  { %295 = vmatprep.subr.mxu1 %v175_v9  ;;  %225 = vmatpush2.msra.mxu0 %v110_v10  ;;  %v155_v49 = vld [vmem:[#allocation2 + $0x338] sm:$0xff]  ;;  %v90_v50 = vld [vmem:[#allocation2 + $0x130] sm:$0xff]  ;;  %v89_v52 = vld [vmem:[#allocation2 + $0x128] sm:$0xff] }
  0x35   :  { %296 = vmatpush2.msra.mxu1 %v174_v11  ;;  %226 = vmatprep.subr.mxu0 %v109_v12  ;;  %v154_v51 = vld [vmem:[#allocation2 + $0x330] sm:$0xff]  ;;  %v153_v53 = vld [vmem:[#allocation2 + $0x328] sm:$0xff]  ;;  %v88_v54 = vld [vmem:[#allocation2 + $0x120] sm:$0xff] }
  0x36   :  { %297 = vmatprep.subr.mxu1 %v173_v13  ;;  %227 = vmatpush2.msra.mxu0 %v108_v14  ;;  %v152_v55 = vld [vmem:[#allocation2 + $0x320] sm:$0xff]  ;;  %v87_v56 = vld [vmem:[#allocation2 + $0x118] sm:$0xff]  ;;  %v86_v58 = vld [vmem:[#allocation2 + $0x110] sm:$0xff] }
  0x37   :  { %298 = vmatpush2.msra.mxu1 %v172_v15  ;;  %228 = vmatprep.subr.mxu0 %v107_v16  ;;  %v151_v57 = vld [vmem:[#allocation2 + $0x318] sm:$0xff]  ;;  %v150_v59 = vld [vmem:[#allocation2 + $0x310] sm:$0xff]  ;;  %v85_v60 = vld [vmem:[#allocation2 + $0x108] sm:$0xff] }
  0x38   :  { %299 = vmatprep.subr.mxu1 %v171_v17  ;;  %229 = vmatpush2.msra.mxu0 %v106_v18  ;;  %v149_v61 = vld [vmem:[#allocation2 + $0x308] sm:$0xff]  ;;  %v84_v62 = vld [vmem:[#allocation2 + $0x100] sm:$0xff]  ;;  %v50_v1 = vld [vmem:[%s1225_s0 + $0x18] sm:$0xff] }
  0x39   :  { %300 = vmatpush2.msra.mxu1 %v170_v19  ;;  %230 = vmatprep.subr.mxu0 %v105_v20  ;;  %v48_v63 = vld [vmem:[%s1225_s0 + $0x8] sm:$0xff]  ;;  %v148_v0 = vld [vmem:[#allocation2 + $0x300] sm:$0xff]  ;;  %v49_v3 = vld [vmem:[%s1225_s0 + $0x10] sm:$0xff] }
  0x3a   :  { %301 = vmatprep.subr.mxu1 %v169_v21  ;;  %231 = vmatpush2.msra.mxu0 %v104_v22  ;;  %v47_v2 = vld [vmem:[%s1225_s0] sm:$0xff]  ;;  %v183_v4 = vld [vmem:[#allocation2 + $0x418] sm:$0xff]  ;;  %v182_v5 = vld [vmem:[#allocation2 + $0x410] sm:$0xff] }
  0x3b   :  { %302 = vmatpush2.msra.mxu1 %v168_v23  ;;  %232 = vmatprep.subr.mxu0 %v103_v24  ;;  %v181_v6 = vld [vmem:[#allocation2 + $0x408] sm:$0xff]  ;;  %v180_v7 = vld [vmem:[#allocation2 + $0x400] sm:$0xff]  ;;  %v483_v10 = vld [vmem:[%s1228_s3 + $0xf8] sm:$0xff] }
  0x3c   :  { %303 = vmatprep.subr.mxu1 %v167_v25  ;;  %233 = vmatpush2.msra.mxu0 %v102_v26  ;;  %v51_v9 = vld [vmem:[%s1225_s0 + $0x20] sm:$0xff]  ;;  %v467_v11 = vld [vmem:[%s1228_s3 + $0x78] sm:$0xff]  ;;  %v482_v12 = vld [vmem:[%s1228_s3 + $0xf0] sm:$0xff]  ;;  %s970_s0 = smov 76  }
  0x3d   :  { %304 = vmatpush2.msra.mxu1 %v166_v27  ;;  %234 = vmatprep.subr.mxu0 %v101_v28  ;;  %v466_v13 = vld [vmem:[%s1228_s3 + $0x70] sm:$0xff]  ;;  %v481_v14 = vld [vmem:[%s1228_s3 + $0xe8] sm:$0xff]  ;;  %v480_v16 = vld [vmem:[%s1228_s3 + $0xe0] sm:$0xff] }
  0x3e   :  { %305 = vmatprep.subr.mxu1 %v165_v29  ;;  %235 = vmatpush2.msra.mxu0 %v100_v30  ;;  %v465_v15 = vld [vmem:[%s1228_s3 + $0x68] sm:$0xff]  ;;  %v464_v17 = vld [vmem:[%s1228_s3 + $0x60] sm:$0xff]  ;;  %v479_v18 = vld [vmem:[%s1228_s3 + $0xd8] sm:$0xff] }
  0x3f   :  { %306 = vmatpush2.msra.mxu1 %v164_v31  ;;  %236 = vmatprep.subr.mxu0 %v99_v32  ;;  %v463_v19 = vld [vmem:[%s1228_s3 + $0x58] sm:$0xff]  ;;  %v478_v20 = vld [vmem:[%s1228_s3 + $0xd0] sm:$0xff]  ;;  %v477_v22 = vld [vmem:[%s1228_s3 + $0xc8] sm:$0xff]  ;;  %v403_v32 = vlaneseq }
  0x40   :  { %307 = vmatprep.subr.mxu1 %v163_v33  ;;  %237 = vmatpush2.msra.mxu0 %v98_v34  ;;  %v462_v21 = vld [vmem:[%s1228_s3 + $0x50] sm:$0xff]  ;;  %v461_v23 = vld [vmem:[%s1228_s3 + $0x48] sm:$0xff]  ;;  %v476_v24 = vld [vmem:[%s1228_s3 + $0xc0] sm:$0xff] }
  0x41   :  { %308 = vmatpush2.msra.mxu1 %v162_v35  ;;  %238 = vmatprep.subr.mxu0 %v97_v36  ;;  %v460_v25 = vld [vmem:[%s1228_s3 + $0x40] sm:$0xff]  ;;  %v475_v26 = vld [vmem:[%s1228_s3 + $0xb8] sm:$0xff]  ;;  %v474_v28 = vld [vmem:[%s1228_s3 + $0xb0] sm:$0xff]  ;;  %v404_v33 = vshrl.u32 %v403_v32, 7 }
  0x42   :  { %309 = vmatprep.subr.mxu1 %v161_v37  ;;  %239 = vmatpush2.msra.mxu0 %v96_v38  ;;  %v459_v27 = vld [vmem:[%s1228_s3 + $0x38] sm:$0xff]  ;;  %v458_v29 = vld [vmem:[%s1228_s3 + $0x30] sm:$0xff]  ;;  %v473_v30 = vld [vmem:[%s1228_s3 + $0xa8] sm:$0xff] }
  0x43   :  { %310 = vmatpush2.msra.mxu1 %v160_v39  ;;  %240 = vmatprep.subr.mxu0 %v95_v40  ;;  %v457_v31 = vld [vmem:[%s1228_s3 + $0x28] sm:$0xff]  ;;  %v405_v36 = vsub.s32 0, %v404_v33  ;;  %v401_v37 = vld [vmem:[%s1227_s2] ss:$2 sm:$0x3]  ;;  %v409_v39 = vsub.s32 1, %v404_v33 }
  0x44   :  { %311 = vmatprep.subr.mxu1 %v159_v41  ;;  %241 = vmatpush2.msra.mxu0 %v94_v42  ;;  %v809_v41 = vld [vmem:[%s1227_s2 + $0x1] ss:$2 sm:$0x3]  ;;  %v588_v33 = vld [vmem:[%s1230_s5 + $0x28] sm:$0xff] }
  0x45   :  { %312 = vmatpush2.msra.mxu1 %v158_v43  ;;  %242 = vmatprep.subr.mxu0 %v93_v44  ;;  %v406_v43 = vrot.slane %v401_v37, %v405_v36  ;;  %v472_v44 = vld [vmem:[%s1228_s3 + $0xa0] sm:$0xff] }
  0x46   :  { %313 = vmatprep.subr.mxu1 %v157_v45  ;;  %243 = vmatpush2.msra.mxu0 %v92_v46  ;;  %v456_v46 = vld [vmem:[%s1228_s3 + $0x20] sm:$0xff] }
  0x47   :  { %314 = vmatpush2.msra.mxu1 %v156_v47  ;;  %244 = vmatprep.subr.mxu0 %v91_v48 }
  0x48   :  { %315 = vmatprep.subr.mxu1 %v155_v49  ;;  %245 = vmatpush2.msra.mxu0 %v90_v50  ;;  %v421_v49 = vrot.slane %v809_v41, %v405_v36  ;;  %v410_v50 = vrot.slane %v401_v37, %v409_v39  ;;  %v586_v36 = vld [vmem:[%s1230_s5 + $0x18] sm:$0xff] }
  0x49   :  { %316 = vmatpush2.msra.mxu1 %v154_v51  ;;  %246 = vmatprep.subr.mxu0 %v89_v52  ;;  %v471_v51 = vld [vmem:[%s1228_s3 + $0x98] sm:$0xff] }
  0x4a   :  { %317 = vmatprep.subr.mxu1 %v153_v53  ;;  %247 = vmatpush2.msra.mxu0 %v88_v54  ;;  %v455_v53 = vld [vmem:[%s1228_s3 + $0x18] sm:$0xff] }
  0x4b   :  { %318 = vmatpush2.msra.mxu1 %v152_v55  ;;  %248 = vmatprep.subr.mxu0 %v87_v56  ;;  %v425_v56 = vrot.slane %v809_v41, %v409_v39  ;;  %v584_v39 = vld [vmem:[%s1230_s5 + $0x8] sm:$0xff] }
  0x4c   :  { %319 = vmatprep.subr.mxu1 %v151_v57  ;;  %249 = vmatpush2.msra.mxu0 %v86_v58  ;;  %v470_v57 = vld [vmem:[%s1228_s3 + $0x90] sm:$0xff] }
  0x4d   :  { %320 = vmatpush2.msra.mxu1 %v150_v59  ;;  %250 = vmatprep.subr.mxu0 %v85_v60  ;;  %v454_v58 = vld [vmem:[%s1228_s3 + $0x10] sm:$0xff] }
  0x4e   :  { %321 = vmatprep.subr.mxu1 %v149_v61  ;;  %251 = vmatpush2.msra.mxu0 %v84_v62  ;;  %v469_v61 = vld [vmem:[%s1228_s3 + $0x88] sm:$0xff] }
  0x4f   :  { %252 = vmatprep.mubr.f32.mxu0 %v48_v63  ;;  %322 = vmatpush2.msra.mxu1 %v148_v0  ;;  %v453_v62 = vld [vmem:[%s1228_s3 + $0x8] sm:$0xff]  ;;  %v468_v0 = vld [vmem:[%s1228_s3 + $0x80] sm:$0xff] }
  0x50   :  { %323 = vmatprep.mubr.f32.mxu1 %v50_v1  ;;  %253 = vmatmul.mubr.f32.vlgmr.msra.gmra.mxu0 %v47_v2  ;;  %v452_v1 = vld [vmem:[%s1228_s3] sm:$0xff] }
  0x51   :  { %324 = vmatmul.mubr.f32.vlgmr.msra.gmra.mxu1 %v49_v3  ;;  %358 = vmatprep.subr.mxu0 %v183_v4 }
  0x52   :  { %394 = vmatprep.mubr.f32.mxu0 %v967_v8  ;;  %359 = vmatpush1.msra.mxu0 %v182_v5  ;;  %v437_v5 = vand.u32 127, %v403_v32  ;;  %v589_v32 = vld [vmem:[%s1230_s5 + $0x30] sm:$0xff] }
  0x53   :  { %360 = vmatprep.subr.mxu0 %v181_v6  ;;  %818 = vmatprep.subr.mxu1 %v483_v10 }
  0x54   :  { %361 = vmatpush1.msra.mxu0 %v180_v7  ;;  %819 = vmatpush3.msra.mxu1 %v467_v11  ;;  %vm438_vm1 = vcmp.lt.s32.totalorder %v437_v5, 124  ;;  %vm447_vm2 = vcmp.lt.s32.totalorder %v437_v5, 120 }
  0x55   :  { %808 = vmatmul.mubr.msk.f32.vlgmr.msra.gmra.mxu0 %vm184_vm0, %v51_v9  ;;  %867 = vmatprep.subr.mxu0 %v967_v8 }
  0x56   :  { %820 = vmatprep.subr.mxu1 %v482_v12  ;;  %887 = vmatprep.mubr.msk.f32.mxu0 %vm971_vm5, %v967_v8 }
  0x57   :  { %821 = vmatpush3.msra.mxu1 %v466_v13 }
  0x58   :  { %822 = vmatprep.subr.mxu1 %v481_v14 }
  0x59   :  { %823 = vmatpush3.msra.mxu1 %v465_v15 }
  0x5a   :  { %824 = vmatprep.subr.mxu1 %v480_v16 }
  0x5b   :  { %825 = vmatpush3.msra.mxu1 %v464_v17 }
  0x5c   :  { %826 = vmatprep.subr.mxu1 %v479_v18 }
  0x5d   :  { %827 = vmatpush3.msra.mxu1 %v463_v19 }
  0x5e   :  { %828 = vmatprep.subr.mxu1 %v478_v20 }
  0x5f   :  { %829 = vmatpush3.msra.mxu1 %v462_v21 }
  0x60   :  { %830 = vmatprep.subr.mxu1 %v477_v22 }
  0x61   :  { %831 = vmatpush3.msra.mxu1 %v461_v23  ;;  %v810_v23 = vld [vmem:[%s1229_s4] ss:$0 sm:$0xff] }
  0x62   :  { %832 = vmatprep.subr.mxu1 %v476_v24 }
  0x63   :  { %833 = vmatpush3.msra.mxu1 %v460_v25  ;;  %v811_v25 = vld [vmem:[%s1229_s4 + $0x1] ss:$0 sm:$0xff] }
  0x64   :  { %834 = vmatprep.subr.mxu1 %v475_v26 }
  0x65   :  { %835 = vmatpush3.msra.mxu1 %v459_v27 }
  0x66   :  { %836 = vmatprep.subr.mxu1 %v474_v28 }
  0x67   :  { %837 = vmatpush3.msra.mxu1 %v458_v29  ;;  %v592_v29 = vld [vmem:[%s1230_s5 + $0x48] sm:$0xf] }
  0x68   :  { %838 = vmatprep.subr.mxu1 %v473_v30  ;;  %v591_v30 = vld [vmem:[%s1230_s5 + $0x40] sm:$0xff]  ;;  %868 = vmatpush3.msk.msra.mxu0 %vm597_vm3, %v592_v29 }
  0x69   :  { %839 = vmatpush3.msra.mxu1 %v457_v31  ;;  %869 = vmatprep.subr.mxu0 %v967_v8  ;;  %v590_v31 = vld [vmem:[%s1230_s5 + $0x38] sm:$0xff] }
  0x6a   :  { %840 = vmatprep.subr.mxu1 %v472_v44  ;;  %870 = vmatpush3.msra.mxu0 %v591_v30 }
  0x6b   :  { %841 = vmatpush3.msra.mxu1 %v456_v46  ;;  %871 = vmatprep.subr.mxu0 %v967_v8 }
  0x6c   :  { %842 = vmatprep.subr.mxu1 %v471_v51  ;;  %872 = vmatpush3.msra.mxu0 %v590_v31 }
  0x6d   :  { %843 = vmatpush3.msra.mxu1 %v455_v53  ;;  %873 = vmatprep.subr.mxu0 %v967_v8 }
  0x6e   :  { %844 = vmatprep.subr.mxu1 %v470_v57  ;;  %874 = vmatpush3.msra.mxu0 %v589_v32  ;;  %v700_v57 = vld [vmem:[%s1232_s7] sm:$0xff] }
  0x6f   :  { %845 = vmatpush3.msra.mxu1 %v454_v58  ;;  %875 = vmatprep.subr.mxu0 %v967_v8 }
  0x70   :  { %846 = vmatprep.subr.mxu1 %v469_v61  ;;  %876 = vmatpush3.msra.mxu0 %v588_v33 }
  0x71   :  { %847 = vmatpush3.msra.mxu1 %v453_v62  ;;  %877 = vmatprep.subr.mxu0 %v967_v8 }
  0x72   :  { %848 = vmatprep.subr.mxu1 %v468_v0 }
  0x73   :  { %849 = vmatpush3.msra.mxu1 %v452_v1 }
 0x110   :  { %v254_v34 = vpop.f32.mrf.mxu0 }
 0x111   :  { %v325_v35 = vpop.f32.mrf.mxu1 }
 0x112   :  { %v256_v38 = vpop.f32.mrf.mxu0  ;;  %v326_v42 = vadd.f32 %v325_v35, %v254_v34  ;;  %v587_v34 = vld [vmem:[%s1230_s5 + $0x20] sm:$0xff] }
 0x113   :  { %v327_v40 = vpop.f32.mrf.mxu1  ;;  %878 = vmatpush3.msra.mxu0 %v587_v34 }
 0x114   :  { %v328_v47 = vadd.f32 %v327_v40, %v256_v38  ;;  %879 = vmatprep.subr.mxu0 %v967_v8  ;;  %v585_v38 = vld [vmem:[%s1230_s5 + $0x10] sm:$0xff]  ;;  %v583_v40 = vld [vmem:[%s1230_s5] sm:$0xff] }
 0x115   :  { %v396_v45 = vpop.f32.mrf.mxu0  ;;  %880 = vmatpush3.msra.mxu0 %v586_v36 }
 0x116   :  { %v397_v48 = vadd.f32 %v396_v45, %v326_v42  ;;  %881 = vmatprep.subr.mxu0 %v967_v8 }
 0x117   :  { %v398_v52 = vpop.f32.mrf.mxu0  ;;  %882 = vmatpush3.msra.mxu0 %v585_v38 }
 0x118   :  { %v413_v54 = vmul.f32 %v406_v43, %v397_v48  ;;  %v399_v55 = vadd.f32 %v398_v52, %v328_v47  ;;  %883 = vmatprep.subr.mxu0 %v967_v8  ;;  %v814_v47 = vld [vmem:[%s1231_s6] ss:$0 sm:$0xff] }
 0x119   :  { %884 = vmatpush3.msra.mxu0 %v584_v39 }
 0x11a   :  { %v428_v59 = vadd.f32 %v421_v49, %v413_v54  ;;  %v414_v60 = vmul.f32 %v410_v50, %v399_v55  ;;  %885 = vmatprep.subr.mxu0 %v967_v8  ;;  %v815_v49 = vld [vmem:[%s1231_s6 + $0x1] ss:$0 sm:$0xff] }
 0x11b   :  { %886 = vmatpush3.msra.mxu0 %v583_v40 }
 0x11c   :  { %v429_v63 = vadd.f32 %v425_v56, %v414_v60  ;;  %v430_v2 = vmax.f32 %v428_v59, 0.0  ;;  %890 = vmatprep.subr.mxu0 %v967_v8  ;;  %v701_v56 = vld [vmem:[%s1232_s7 + $0x8] sm:$0xff]  ;;  %s972_s7 = smov [#allocation5]  }
 0x11e   :  { %v431_v3 = vmax.f32 %v429_v63, 0.0 }
 0x120   :  { %v906_v4 = vpack.i.bf16 %v431_v3, %v430_v2 }
 0x122   :  { %907 = vrot.lane.b32.xlu0 %v906_v4, %s968_s26 }
 0x126   :  { %912 = vrot.lane.b32.xlu0 %v906_v4, %s969_s27 }
 0x194   :  { %v908_v6 = vpop.permute.xlu0 %907 }
 0x195   :  { %v910_v7 = vunpack.i.h.bf16 %v908_v6  ;;  %v909_v9 = vunpack.i.l.bf16 %v908_v6 }
 0x197   :  { %v439_v10 = vsel %vm438_vm1, %v909_v9, %v910_v7  ;;  %v440_v11 = vsel %vm438_vm1, %v910_v7, %v909_v9 }
 0x198   :  { %v913_v12 = vpop.permute.xlu0 %912  ;;  %v441_v15 = vmax.f32 %v430_v2, %v439_v10  ;;  %v442_v16 = vmax.f32 %v431_v3, %v440_v11 }
 0x199   :  { %v915_v13 = vunpack.i.h.bf16 %v913_v12  ;;  %v914_v14 = vunpack.i.l.bf16 %v913_v12 }
 0x19b   :  { %v448_v17 = vsel %vm447_vm2, %v914_v14, %v915_v13  ;;  %v449_v18 = vsel %vm447_vm2, %v915_v13, %v914_v14 }
 0x19c   :  { %v450_v19 = vmax.f32 %v441_v15, %v448_v17  ;;  %v451_v20 = vmax.f32 %v442_v16, %v449_v18 }
 0x19e   :  { %548 = vmatprep.mubr.f32.mxu1 %v451_v20 }
 0x19f   :  { %549 = vmatmul.mubr.f32.vlgmr.msra.gmra.mxu1 %v450_v19 }
 0x25f   :  { %v850_v21 = vpop.f32.mrf.mxu1 }
 0x261   :  { %v851_v22 = vpop.f32.mrf.mxu1 }
 0x262   :  { %v852_v24 = vadd.f32 %v851_v22, %v850_v21 }
 0x264   :  { %v559_v26 = vmul.f32 %v852_v24, %v810_v23 }
 0x266   :  { %v565_v27 = vadd.f32 %v811_v25, %v559_v26 }
 0x268   :  { %v566_v28 = vmax.f32 %v565_v27, 0.0 }
 0x26a   :  { %568 = vrot.lane.b32.xlu1 %v566_v28, %s970_s0 }
 0x2dc   :  { %v569_v35 = vpop.permute.xlu1 %568 }
 0x2dd   :  { %v570_v37 = vsel %vm567_vm4, %v569_v35, %v566_v28 }
 0x2de   :  { %571 = vrot.lane.b32.xlu1 %v570_v37, %s970_s0 }
 0x350   :  { %v572_v41 = vpop.permute.xlu1 %571 }
 0x351   :  { %v573_v42 = vsel %vm567_vm4, %v572_v41, %v566_v28 }
 0x352   :  { %579 = vrot.lane.b32.xlu1 %v573_v42, %s969_s27  ;;  %575 = vrot.lane.b32.xlu0 %v573_v42, %s968_s26 }
 0x3c4   :  { %v576_v43 = vpop.permute.xlu0 %575  ;;  %v580_v45 = vpop.permute.xlu1 %579 }
 0x3c5   :  { %v578_v44 = vmax.f32 %v566_v28, %v576_v43 }
 0x3c7   :  { %v582_v46 = vmax.f32 %v578_v44, %v580_v45 }
 0x3c9   :  { %888 = vmatmul.mubr.msk.f32.vlgmr.msra.gmra.mxu0 %vm593_vm6, %v582_v46 }
 0x3ca   :  { %894 = vmatprep.mubr.msk.f32.mxu0 %vm971_vm5, %v967_v8  ;;  %891 = vmatpush3.msra.mxu0 %v701_v56 }
 0x3cb   :  { %892 = vmatprep.subr.mxu0 %v967_v8  ;;  %v816_v8 = vld [vmem:[%s1233_s8] ss:$0 sm:$0xff] }
 0x3cc   :  { %893 = vmatpush3.msra.mxu0 %v700_v57 }
 0x489   :  { %v667_v48 = vpop.f32.mrf.mxu0 }
 0x48a   :  { %v676_v50 = vmul.f32 %v814_v47, %v667_v48 }
 0x48b   :  { %v889_v51 = vpop.f32.mrf.mxu0 }
 0x48c   :  { %v682_v52 = vadd.f32 %v815_v49, %v676_v50 }
 0x48e   :  { %v683_v53 = vmax.f32 %v682_v52, 0.0 }
 0x490   :  { %685 = vrot.lane.b32.xlu0 %v683_v53, %s966_s13 }
 0x502   :  { %v686_v54 = vpop.permute.xlu0 %685 }
 0x503   :  { %v687_v55 = vsel %vm684_vm7, %v686_v54, %v683_v53 }
 0x504   :  { %688 = vrot.lane.b32.xlu1 %v687_v55, %s966_s13 }
 0x576   :  { %v689_v58 = vpop.permute.xlu1 %688 }
 0x577   :  { %v690_v59 = vsel %vm684_vm7, %v689_v58, %v683_v53 }
 0x578   :  { %696 = vrot.lane.b32.xlu1 %v690_v59, %s969_s27  ;;  %692 = vrot.lane.b32.xlu0 %v690_v59, %s968_s26  ;;  %s799_s26 = sshll.u32 %s972_s7, 4  ;;  %s800_s26 = int_to_ptr.vmem [resolvable:$true] %s799_s26 }
 0x579   :  { %s940_s8 = scalar_lea.vmem %s800_s26, 128  ;;  %p945_p6 = scmp.lt.s32.totalorder %s800_s26, %s800_s26 }
 0x57a   :  { %p941_p5 = scmp.ne.s32.totalorder %s800_s26, %s940_s8  ;;  %p946_p7 = scmp.lt.s32.totalorder %s940_s8, %s940_s8 }
 0x57c   :  { %p947_p8 = por %p946_p7, %p945_p6 }
 0x57e   :  { %p948_p9 = pnand %p947_p8, %p941_p5 }
 0x5ea   :  { %v693_v60 = vpop.permute.xlu0 %692  ;;  %v697_v62 = vpop.permute.xlu1 %696 }
 0x5eb   :  { %v695_v61 = vmax.f32 %v683_v53, %v693_v60 }
 0x5ed   :  { %v699_v63 = vmax.f32 %v695_v61, %v697_v62 }
 0x5ef   :  { %895 = vmatmul.mubr.msk.f32.vlgmr.msra.gmra.mxu0 %vm184_vm0, %v699_v63 }
 0x6af   :  { %v778_v0 = vpop.f32.mrf.mxu0 }
 0x6b0   :  { %v779_v1 = vadd.f32 %v816_v8, %v778_v0 }
 0x6b1   :  { %v896_v2 = vpop.f32.mrf.mxu0 }
 0x6b2   :  { %782 = vmax.xlane.f32.xlu0 %v779_v1 }
 0x73b   :  { %v783_v3 = vpop.xlane.xlu0 %782 }
 0x73c   :  { %v784_v4 = vsub.f32 %v779_v1, %v783_v3 }
 0x73e   :  { %v785_v5 = vmul.f32 1.442695, %v784_v4 }
 0x740   :  { %916 = vpow2.f32 %v785_v5 }
 0x74d   :  { %v917_v6 = vpop.eup %916 }
 0x74e   :  { %787 = vadd.xlane.f32.xlu1 %v917_v6 }
 0x7d7   :  { %v788_v7 = vpop.xlane.xlu1 %787 }
 0x7d8   :  { %918 = vlog2.f32 %v788_v7 }
 0x7e5   :  { %v919_v9 = vpop.eup %918 }
 0x7e6   :  { %v790_v10 = vmul.f32 0.6931472, %v919_v9 }
 0x7e8   :  { %v791_v11 = vsub.f32 %v784_v4, %v790_v10 }
 0x7ea   :  { %792 = vst [vmem:[#allocation5] sm:$0xff] %v791_v11 }
 0x7eb   :  { %951 = shalt.err (!%p948_p9)
}
 0x7ec   :  { %802 = dma.vmem_to_hbm [thread:$0]  %s800_s26, 128, %s1234_s9, [#allocation4]  }
 0x7ed   :  { %962 = dma.done.wait [#allocation4], 128  }
 0x7ee   :  { %963 = vsyncadd [#allocation4], 4294967168 }
 0x7ef   :  { %806 = vsyncpa [#allocation3], 1 }
 0x7f0   :  { %807 = vsyncpa [#allocation4], 1 }

</bundles_post_ra>
